<compile_context>
chip_gen: v6e
topology: v6e:2x2x1
jax: 0.10.0
libtpu: 0.0.40
codegen_flags: <defaults>
</compile_context>

<pallas_src>
import math
import jax
import jax.numpy as jnp
from jax.experimental import pallas as pl
from jax.experimental.pallas import tpu as pltpu


def _round_up(x, m):
    return ((x + m - 1) // m) * m


def _cdiv(a, b):
    return -(-a // b)


# ----------------------------- kernels ---------------------------------------


def _conv1x1_tiled_kernel(x_ref, w_ref, b_ref, o_ref):
    # x_ref: (1, Cin, THW)   w_ref: (Cout, Cin)   b_ref: (Cout, 1)   o_ref: (1, Cout, THW)
    acc = jnp.dot(w_ref[...], x_ref[0], preferred_element_type=jnp.float32)
    o_ref[0] = (acc + b_ref[...]).astype(o_ref.dtype)


def _conv1x1_batched_kernel(x_ref, w_ref, b_ref, o_ref):
    # x_ref: (Bb, Cin, HW)   w_ref: (Cout, Cin)   b_ref: (Cout, 1)   o_ref: (Bb, Cout, HW)
    # Bb is small and static -> unrolled loop of MXU matmuls inside one grid step
    # (one big DMA per block instead of one grid step per image).
    w = w_ref[...]
    bcol = b_ref[...]
    for i in range(x_ref.shape[0]):
        acc = jnp.dot(w, x_ref[i], preferred_element_type=jnp.float32)
        o_ref[i] = (acc + bcol).astype(o_ref.dtype)


# ----------------------------- tiling helpers --------------------------------

_VMEM_TILE_BUDGET = 10 << 20   # in+out tiles incl. multi-buffering; fits v5e's 16 MiB default
_SMALL_HW_BYTES = 1 << 20      # threshold for the batched small-image path
_MAX_BATCH_BLOCK = 8           # cap on images per grid step (small-HW path)


def _default_max_tile_hw(Cin, Cout, itemsize):
    # x tile buffered 3-deep, out tile 2-deep.
    per_lane = (3 * Cin + 2 * Cout) * itemsize
    t = (_VMEM_TILE_BUDGET // per_lane) // 128 * 128
    return int(max(128, min(t, 16384)))


def _select_tile_hw(HW, max_tile_hw):
    # Lane-dense (multiple of 128) and tail-balanced.
    max_tile_hw = max(128, (max_tile_hw // 128) * 128)
    if HW <= max_tile_hw:
        return _round_up(HW, 128)
    n_tiles = _cdiv(HW, max_tile_hw)
    return _round_up(_cdiv(HW, n_tiles), 128)


def _maybe_vmem_limit(footprint_bytes):
    # Only raise the scoped-VMEM limit if the tiles wouldn't fit the smallest
    # default (v5e: 16 MiB); stay well under v7x's 64 MiB physical VMEM.
    if footprint_bytes <= (14 << 20):
        return None
    return int(min(footprint_bytes + (4 << 20), 48 << 20))


# ----------------------------- wrapper ----------------------------------------


def spatial_prior_reduction(x_nchw, weight, bias, *, max_tile_hw=None):
    """1x1 conv in NCHW.  x_nchw: (B, Cin, H, W); weight: (Cout, Cin, 1, 1); bias: (Cout,)."""
    B, Cin, H, W = x_nchw.shape
    Cout = weight.shape[0]
    HW = H * W
    itemsize = jnp.dtype(x_nchw.dtype).itemsize

    # Free reshapes (HW is already contiguous in NCHW) — no data movement.
    x_flat = x_nchw.reshape(B, Cin, HW)
    w_mat = weight.reshape(Cout, Cin)          # (Cout, Cin): out = W @ x
    b_col = bias.reshape(Cout, 1)              # broadcasts over the lane (HW) dim

    if max_tile_hw is None:
        max_tile_hw = _default_max_tile_hw(Cin, Cout, itemsize)
    tile_hw = _select_tile_hw(HW, max_tile_hw)
    n_hw = _cdiv(HW, tile_hw)

    cost = pl.CostEstimate(
        flops=2 * B * HW * Cin * Cout,
        transcendentals=0,
        bytes_accessed=itemsize * (B * HW * Cin + Cout * Cin + Cout + B * HW * Cout),
    )
    param_bytes = (Cout * Cin + Cout) * itemsize * 2  # weight + bias (double-buffered)

    small_hw = (n_hw == 1 and B > 1 and
                tile_hw * (Cin + Cout) * itemsize <= _SMALL_HW_BYTES)

    if small_hw:
        # ---- small-image path: block several batch images into one grid step ----
        per_batch_bytes = (Cin + Cout) * HW * itemsize
        Bb = max(1, min(B, _MAX_BATCH_BLOCK,
                        (_VMEM_TILE_BUDGET // 2) // max(1, per_batch_bytes)))
        footprint = 2 * Bb * per_batch_bytes + param_bytes

        out_flat = pl.pallas_call(
            _conv1x1_batched_kernel,
            out_shape=jax.ShapeDtypeStruct((B, Cout, HW), x_nchw.dtype),
            grid_spec=pltpu.PrefetchScalarGridSpec(
                num_scalar_prefetch=0,
                grid=(_cdiv(B, Bb),),
                in_specs=[
                    # whole-image activation block for Bb images; Cin/HW are full dims.
                    pl.BlockSpec((Bb, Cin, HW), lambda g: (g, 0, 0)),
                    pl.BlockSpec((Cout, Cin), lambda g: (0, 0)),
                    pl.BlockSpec((Cout, 1), lambda g: (0, 0)),
                ],
                out_specs=pl.BlockSpec((Bb, Cout, HW), lambda g: (g, 0, 0)),
            ),
            compiler_params=pltpu.CompilerParams(
                dimension_semantics=("parallel",),
                vmem_limit_bytes=_maybe_vmem_limit(footprint)),
            cost_estimate=cost,
        )(x_flat, w_mat, b_col)
    else:
        # ---- general path: lane-dense spatial tiles, batch as an outer grid axis ----
        footprint = (3 * Cin + 2 * Cout) * tile_hw * itemsize + param_bytes

        out_flat = pl.pallas_call(
            _conv1x1_tiled_kernel,
            out_shape=jax.ShapeDtypeStruct((B, Cout, HW), x_nchw.dtype),
            grid_spec=pltpu.PrefetchScalarGridSpec(
                num_scalar_prefetch=0,
                grid=(B, n_hw),
                in_specs=[
                    # activation tile: (1, Cin, tile_hw); 3-deep pipelining to hide
                    # DMA issue latency on short, mem-bound steps.
                    pl.BlockSpec((1, Cin, tile_hw), lambda b, t: (b, 0, t),
                                 pipeline_mode=pl.Buffered(3)),
                    # weight: whole (Cout, Cin), resident across the grid.
                    pl.BlockSpec((Cout, Cin), lambda b, t: (0, 0)),
                    # bias: (Cout, 1), resident across the grid.
                    pl.BlockSpec((Cout, 1), lambda b, t: (0, 0)),
                ],
                out_specs=pl.BlockSpec((1, Cout, tile_hw), lambda b, t: (b, 0, t)),
            ),
            compiler_params=pltpu.CompilerParams(
                # Both axes independent; on v7x megacore this lets the runtime
                # shard grid steps across the two TensorCores.
                dimension_semantics=("parallel", "parallel"),
                vmem_limit_bytes=_maybe_vmem_limit(footprint)),
            cost_estimate=cost,
        )(x_flat, w_mat, b_col)

    # Free reshape back to NCHW.
    return out_flat.reshape(B, Cout, H, W)


# ----------------------------- self-test --------------------------------------

if __name__ == "__main__":
    # Small, shape-consistent instance: N=32 -> Cin = N*2+2 = 66, Cout = N = 32.
    N = 32
    Cin, Cout = N * 2 + 2, N

    key = jax.random.PRNGKey(0)
    kx, kw, kb, kx2 = jax.random.split(key, 4)

    # Deterministic parameter init mimicking PyTorch Conv2d defaults (uniform +/- 1/sqrt(fan_in)).
    fan_in = Cin * 1 * 1
    bound = 1.0 / math.sqrt(fan_in)
    weight = jax.random.uniform(kw, (Cout, Cin, 1, 1), minval=-bound, maxval=bound,
                                dtype=jnp.float32)
    bias = jax.random.uniform(kb, (Cout,), minval=-bound, maxval=bound, dtype=jnp.float32)

    def ref_conv(x):
        return (jnp.einsum("bchw,oc->bohw", x, weight.reshape(Cout, Cin))
                + bias[None, :, None, None])

    # --- Test 1: small 16x16 feature map -> exercises the batched small-HW path ---
    B, H, W = 2, 16, 16
    x = jax.random.normal(kx, (B, Cin, H, W), dtype=jnp.float32)
    out = jax.block_until_ready(spatial_prior_reduction(x, weight, bias))
    assert out.shape == (B, Cout, H, W)
    assert jnp.allclose(out, ref_conv(x), atol=1e-4, rtol=1e-4)

    # --- Test 2: ragged HW (17x17 = 289) with a forced small tile cap ->
    #             exercises the tiled path, Buffered(3) pipelining and the masked tail ---
    B2, H2, W2 = 2, 17, 17
    x2 = jax.random.normal(kx2, (B2, Cin, H2, W2), dtype=jnp.float32)
    out2 = jax.block_until_ready(
        spatial_prior_reduction(x2, weight, bias, max_tile_hw=128))
    assert out2.shape == (B2, Cout, H2, W2)
    assert jnp.allclose(out2, ref_conv(x2), atol=1e-4, rtol=1e-4)

    print("KERNEL_OK")
</pallas_src>

<mosaic_0001>
module attributes {stable_mosaic.version = 11 : i64} {
  func.func @_conv1x1_batched_kernel(%arg0: i32, %arg1: memref<2x66x256xf32, #tpu.memory_space<vmem>>, %arg2: memref<32x66xf32, #tpu.memory_space<vmem>>, %arg3: memref<32x1xf32, #tpu.memory_space<vmem>>, %arg4: memref<2x32x256xf32, #tpu.memory_space<vmem>>) attributes {dimension_semantics = [#tpu.dimension_semantics<parallel>], iteration_bounds = array<i64: 1>, scalar_prefetch = 0 : i64, scratch_operands = 0 : i64, tpu.core_type = #tpu.core_type<tc>, window_params = [{transform_indices = @transform_0, window_bounds = array<i64: 2, 66, 256>}, {pipeline_mode = #tpu.pipeline_mode<synchronous>, transform_indices = @transform_1, window_bounds = array<i64: 32, 66>}, {pipeline_mode = #tpu.pipeline_mode<synchronous>, transform_indices = @transform_2, window_bounds = array<i64: 32, 1>}, {transform_indices = @transform_3, window_bounds = array<i64: 2, 32, 256>}]} {
    %c0 = arith.constant 0 : index
    %c0_0 = arith.constant 0 : index
    %0 = vector.load %arg2[%c0, %c0_0] : memref<32x66xf32, #tpu.memory_space<vmem>>, vector<32x66xf32>
    %c0_1 = arith.constant 0 : index
    %c0_2 = arith.constant 0 : index
    %1 = vector.load %arg3[%c0_1, %c0_2] : memref<32x1xf32, #tpu.memory_space<vmem>>, vector<32x1xf32>
    %c0_3 = arith.constant 0 : index
    %c0_4 = arith.constant 0 : index
    %c0_5 = arith.constant 0 : index
    %2 = vector.load %arg1[%c0_3, %c0_4, %c0_5] : memref<2x66x256xf32, #tpu.memory_space<vmem>>, vector<1x66x256xf32>
    %3 = vector.shape_cast %2 : vector<1x66x256xf32> to vector<66x256xf32>
    %cst = arith.constant dense<0.000000e+00> : vector<32x256xf32>
    %4 = tpu.matmul %0, %3, %cst {dimension_numbers = #tpu.dot_dimension_numbers<[1], [0], [0], [1], [0, 0, 1, 1], [], []>} : vector<32x66xf32>, vector<66x256xf32>, vector<32x256xf32> -> vector<32x256xf32>
    %5 = vector.broadcast %1 : vector<32x1xf32> to vector<32x256xf32>
    %6 = arith.addf %4, %5 : vector<32x256xf32>
    %c0_6 = arith.constant 0 : index
    %c0_7 = arith.constant 0 : index
    %c0_8 = arith.constant 0 : index
    %7 = vector.load %arg4[%c0_6, %c0_7, %c0_8] : memref<2x32x256xf32, #tpu.memory_space<vmem>>, vector<1x32x256xf32>
    %8 = vector.shape_cast %7 : vector<1x32x256xf32> to vector<32x256xf32>
    %9 = vector.shape_cast %6 : vector<32x256xf32> to vector<1x32x256xf32>
    tpu.vector_store %arg4[%c0_6, %c0_7, %c0_8], %9 {strides = array<i32>} : memref<2x32x256xf32, #tpu.memory_space<vmem>>, vector<1x32x256xf32>,
    %c1 = arith.constant 1 : index
    %c0_9 = arith.constant 0 : index
    %c0_10 = arith.constant 0 : index
    %10 = vector.load %arg1[%c1, %c0_9, %c0_10] : memref<2x66x256xf32, #tpu.memory_space<vmem>>, vector<1x66x256xf32>
    %11 = vector.shape_cast %10 : vector<1x66x256xf32> to vector<66x256xf32>
    %cst_11 = arith.constant dense<0.000000e+00> : vector<32x256xf32>
    %12 = tpu.matmul %0, %11, %cst_11 {dimension_numbers = #tpu.dot_dimension_numbers<[1], [0], [0], [1], [0, 0, 1, 1], [], []>} : vector<32x66xf32>, vector<66x256xf32>, vector<32x256xf32> -> vector<32x256xf32>
    %13 = vector.broadcast %1 : vector<32x1xf32> to vector<32x256xf32>
    %14 = arith.addf %12, %13 : vector<32x256xf32>
    %c1_12 = arith.constant 1 : index
    %c0_13 = arith.constant 0 : index
    %c0_14 = arith.constant 0 : index
    %15 = vector.load %arg4[%c1_12, %c0_13, %c0_14] : memref<2x32x256xf32, #tpu.memory_space<vmem>>, vector<1x32x256xf32>
    %16 = vector.shape_cast %15 : vector<1x32x256xf32> to vector<32x256xf32>
    %17 = vector.shape_cast %14 : vector<32x256xf32> to vector<1x32x256xf32>
    tpu.vector_store %arg4[%c1_12, %c0_13, %c0_14], %17 {strides = array<i32>} : memref<2x32x256xf32, #tpu.memory_space<vmem>>, vector<1x32x256xf32>,
    return
  }
  func.func @transform_0(%arg0: i32) -> (i32, i32, i32) {
    %c0_i32 = arith.constant 0 : i32
    %c0_i32_0 = arith.constant 0 : i32
    %c0_i32_1 = arith.constant 0 : i32
    return %arg0, %c0_i32, %c0_i32_0 : i32, i32, i32
  }
  func.func @transform_1(%arg0: i32) -> (i32, i32) {
    %c0_i32 = arith.constant 0 : i32
    %c0_i32_0 = arith.constant 0 : i32
    %c0_i32_1 = arith.constant 0 : i32
    return %c0_i32, %c0_i32_0 : i32, i32
  }
  func.func @transform_2(%arg0: i32) -> (i32, i32) {
    %c0_i32 = arith.constant 0 : i32
    %c0_i32_0 = arith.constant 0 : i32
    %c0_i32_1 = arith.constant 0 : i32
    return %c0_i32, %c0_i32_0 : i32, i32
  }
  func.func @transform_3(%arg0: i32) -> (i32, i32, i32) {
    %c0_i32 = arith.constant 0 : i32
    %c0_i32_0 = arith.constant 0 : i32
    %c0_i32_1 = arith.constant 0 : i32
    return %arg0, %c0_i32, %c0_i32_0 : i32, i32, i32
  }
}

</mosaic_0001>

<bundles_post_ra>
// kernel: tpu_custom_call.1
= control target key start
LH: loop header
LB: loop body
LE: loop exit
PB: predicated region body
PF: predicated region fallthrough
CT: control target
= control target key end

     0   :  { %vm74_vm0 = vcmask 1041408   ;;  %s544_s0 = inlined_call_operand.vmem [shape: f32[2,66,256], index: 0, kind: input, shape index: {}]   ;;  %s545_s1 = inlined_call_operand.vmem [shape: f32[32,66], index: 1, kind: input, shape index: {}]   ;;  %s546_s2 = inlined_call_operand.vmem [shape: f32[32,1], index: 2, kind: input, shape index: {}]   ;;  %s547_s3 = inlined_call_operand.hbm [shape: f32[2,32,256], index: 3, kind: output, shape index: {}]  }
   0x1   :  { %v40_v0 = vld [vmem:[%s544_s0 + $0x88] sm:$0x3]  ;;  %v340_v1 = vld [vmem:[%s544_s0 + $0x118] sm:$0x3]  ;;  %v39_v3 = vld [vmem:[%s544_s0 + $0x80] sm:$0x3] }
   0x2   :  { %v38_v2 = vld [vmem:[%s544_s0 + $0x78] sm:$0xff]  ;;  %317 = vmatprep.subr.msk.mxu0 %vm74_vm0, %v40_v0  ;;  %341 = vmatprep.subr.msk.mxu1 %vm74_vm0, %v340_v1  ;;  %v339_v4 = vld [vmem:[%s544_s0 + $0x110] sm:$0x3]  ;;  %v338_v5 = vld [vmem:[%s544_s0 + $0x108] sm:$0xff] }
   0x3   :  { %318 = vmatpush1.msk.msra.mxu0 %vm74_vm0, %v39_v3  ;;  %342 = vmatpush1.msk.msra.mxu1 %vm74_vm0, %v339_v4  ;;  %v37_v6 = vld [vmem:[%s544_s0 + $0x70] sm:$0xff]  ;;  %v337_v7 = vld [vmem:[%s544_s0 + $0x100] sm:$0xff]  ;;  %v36_v8 = vld [vmem:[%s544_s0 + $0x68] sm:$0xff] }
   0x4   :  { %97 = vmatprep.subr.mxu0 %v38_v2  ;;  %219 = vmatprep.subr.mxu1 %v338_v5  ;;  %v336_v9 = vld [vmem:[%s544_s0 + $0xf8] sm:$0xff]  ;;  %v35_v10 = vld [vmem:[%s544_s0 + $0x60] sm:$0xff]  ;;  %v335_v11 = vld [vmem:[%s544_s0 + $0xf0] sm:$0xff] }
   0x5   :  { %98 = vmatpush1.msra.mxu0 %v37_v6  ;;  %220 = vmatpush1.msra.mxu1 %v337_v7  ;;  %v34_v12 = vld [vmem:[%s544_s0 + $0x58] sm:$0xff]  ;;  %v334_v13 = vld [vmem:[%s544_s0 + $0xe8] sm:$0xff]  ;;  %v33_v14 = vld [vmem:[%s544_s0 + $0x50] sm:$0xff] }
   0x6   :  { %99 = vmatprep.subr.mxu0 %v36_v8  ;;  %221 = vmatprep.subr.mxu1 %v336_v9  ;;  %v333_v15 = vld [vmem:[%s544_s0 + $0xe0] sm:$0xff]  ;;  %v32_v16 = vld [vmem:[%s544_s0 + $0x48] sm:$0xff]  ;;  %v332_v17 = vld [vmem:[%s544_s0 + $0xd8] sm:$0xff] }
   0x7   :  { %100 = vmatpush1.msra.mxu0 %v35_v10  ;;  %222 = vmatpush1.msra.mxu1 %v335_v11  ;;  %v31_v18 = vld [vmem:[%s544_s0 + $0x40] sm:$0xff]  ;;  %v331_v19 = vld [vmem:[%s544_s0 + $0xd0] sm:$0xff]  ;;  %v30_v20 = vld [vmem:[%s544_s0 + $0x38] sm:$0xff] }
   0x8   :  { %101 = vmatprep.subr.mxu0 %v34_v12  ;;  %223 = vmatprep.subr.mxu1 %v334_v13  ;;  %v330_v21 = vld [vmem:[%s544_s0 + $0xc8] sm:$0xff]  ;;  %v29_v22 = vld [vmem:[%s544_s0 + $0x30] sm:$0xff]  ;;  %v329_v23 = vld [vmem:[%s544_s0 + $0xc0] sm:$0xff] }
   0x9   :  { %102 = vmatpush1.msra.mxu0 %v33_v14  ;;  %224 = vmatpush1.msra.mxu1 %v333_v15  ;;  %v28_v24 = vld [vmem:[%s544_s0 + $0x28] sm:$0xff]  ;;  %v328_v25 = vld [vmem:[%s544_s0 + $0xb8] sm:$0xff]  ;;  %v27_v26 = vld [vmem:[%s544_s0 + $0x20] sm:$0xff] }
   0xa   :  { %103 = vmatprep.subr.mxu0 %v32_v16  ;;  %225 = vmatprep.subr.mxu1 %v332_v17  ;;  %v327_v27 = vld [vmem:[%s544_s0 + $0xb0] sm:$0xff]  ;;  %v26_v28 = vld [vmem:[%s544_s0 + $0x18] sm:$0xff]  ;;  %v326_v29 = vld [vmem:[%s544_s0 + $0xa8] sm:$0xff] }
   0xb   :  { %104 = vmatpush1.msra.mxu0 %v31_v18  ;;  %226 = vmatpush1.msra.mxu1 %v331_v19  ;;  %v25_v30 = vld [vmem:[%s544_s0 + $0x10] sm:$0xff]  ;;  %v325_v31 = vld [vmem:[%s544_s0 + $0xa0] sm:$0xff]  ;;  %v24_v32 = vld [vmem:[%s544_s0 + $0x8] sm:$0xff] }
   0xc   :  { %105 = vmatprep.subr.mxu0 %v30_v20  ;;  %227 = vmatprep.subr.mxu1 %v330_v21  ;;  %v324_v33 = vld [vmem:[%s544_s0 + $0x98] sm:$0xff] }
   0xd   :  { %106 = vmatpush1.msra.mxu0 %v29_v22  ;;  %228 = vmatpush1.msra.mxu1 %v329_v23 }
   0xe   :  { %107 = vmatprep.subr.mxu0 %v28_v24  ;;  %229 = vmatprep.subr.mxu1 %v328_v25 }
   0xf   :  { %108 = vmatpush1.msra.mxu0 %v27_v26  ;;  %230 = vmatpush1.msra.mxu1 %v327_v27 }
  0x10   :  { %8 = vsyncpa [#allocation3], 0  ;;  %109 = vmatprep.subr.mxu0 %v26_v28  ;;  %231 = vmatprep.subr.mxu1 %v326_v29  ;;  %v23_v34 = vld [vmem:[%s544_s0] sm:$0xff]  ;;  %v323_v35 = vld [vmem:[%s544_s0 + $0x90] sm:$0xff]  ;;  %vm61_vm1 = vcmask 539648   ;;  %v376_v37 = vmov 0.0  }
  0x11   :  { %110 = vmatpush1.msra.mxu0 %v25_v30  ;;  %232 = vmatpush1.msra.mxu1 %v325_v31  ;;  %v15_v36 = vld [vmem:[%s545_s1] sm:$0xff]  ;;  %v21_v39 = vld [vmem:[%s546_s2 + $0x10] sm:$0xff]  ;;  %v16_v40 = vld [vmem:[%s545_s1 + $0x8] sm:$0xff]  ;;  %v377_v41 = vmov 0  }
  0x12   :  { %111 = vmatprep.subr.mxu0 %v24_v32  ;;  %233 = vmatprep.subr.mxu1 %v324_v33  ;;  %v19_v38 = vld [vmem:[%s546_s2] sm:$0xff]  ;;  %v20_v42 = vld [vmem:[%s546_s2 + $0x8] sm:$0xff]  ;;  %v22_v43 = vld [vmem:[%s546_s2 + $0x18] sm:$0xff] }
  0x13   :  { %112 = vmatpush1.msra.mxu0 %v23_v34  ;;  %145 = vmatprep.mubr.f32.mxu0 %v376_v37  ;;  %v17_v44 = vld [vmem:[%s545_s1 + $0x10] sm:$0xff]  ;;  %v18_v45 = vld [vmem:[%s545_s1 + $0x18] sm:$0xff]  ;;  %s378_s1 = smov [#allocation2]  }
  0x14   :  { %234 = vmatpush1.msra.mxu1 %v323_v35  ;;  %267 = vmatprep.mubr.f32.mxu1 %v376_v37  ;;  %s306_s2 = sshll.u32 %s378_s1, 4  ;;  %s307_s2 = int_to_ptr.vmem [resolvable:$true] %s306_s2 }
  0x15   :  { %319 = vmatmul.mubr.msk.f32.vlgmr.msra.gmra.mxu0 %vm61_vm1, %v15_v36  ;;  %343 = vmatmul.mubr.msk.f32.vlgmr.msra.gmra.mxu1 %vm61_vm1, %v15_v36  ;;  %s354_s18 = scalar_lea.vmem %s307_s2, 2048  ;;  %p359_p1 = scmp.lt.s32.totalorder %s307_s2, %s307_s2 }
  0x16   :  { %151 = vmatprep.mubr.f32.mxu0 %v376_v37  ;;  %273 = vmatprep.mubr.f32.mxu1 %v376_v37  ;;  %p355_p0 = scmp.ne.s32.totalorder %s307_s2, %s354_s18  ;;  %p360_p2 = scmp.lt.s32.totalorder %s354_s18, %s354_s18 }
  0x17   :  { %352 = vset.pattern.permute.xlu0 %v377_v41  ;;  %353 = vset.pattern.permute.xlu1 %v377_v41 }
  0x18   :  { %43 = vperm.xlu0 %352, %v19_v38   ;;  %53 = vperm.xlu1 %353, %v21_v39   ;;  %p361_p3 = por %p360_p2, %p359_p1 }
  0x19   :  { %320 = vmatmul.mubr.msk.f32.gmra.mxu0 %vm61_vm1, %v16_v40  ;;  %344 = vmatmul.mubr.msk.f32.gmra.mxu1 %vm61_vm1, %v16_v40 }
  0x1a   :  { %157 = vmatprep.mubr.f32.mxu0 %v376_v37  ;;  %279 = vmatprep.mubr.f32.mxu1 %v376_v37  ;;  %p362_p4 = pnand %p361_p3, %p355_p0 }
  0x1c   :  { %48 = vperm.xlu0 %352, %v20_v42   ;;  %58 = vperm.xlu1 %353, %v22_v43  }
  0x1d   :  { %321 = vmatmul.mubr.msk.f32.gmra.mxu0 %vm61_vm1, %v17_v44  ;;  %345 = vmatmul.mubr.msk.f32.gmra.mxu1 %vm61_vm1, %v17_v44 }
  0x1e   :  { %163 = vmatprep.mubr.f32.mxu0 %v376_v37  ;;  %285 = vmatprep.mubr.f32.mxu1 %v376_v37 }
  0x21   :  { %322 = vmatmul.mubr.msk.f32.gmra.mxu0 %vm61_vm1, %v18_v45  ;;  %346 = vmatmul.mubr.msk.f32.gmra.mxu1 %vm61_vm1, %v18_v45 }
  0x93   :  { %v44_v46 = vpop.permute.xlu0 %43  ;;  %v54_v60 = vpop.permute.xlu1 %53 }
  0x97   :  { %v49_v51 = vpop.permute.xlu0 %48  ;;  %v59_v7 = vpop.permute.xlu1 %58 }
  0xd5   :  { %v147_v47 = vpop.f32.mrf.mxu0  ;;  %v269_v48 = vpop.f32.mrf.mxu1 }
  0xd6   :  { %v148_v49 = vadd.f32 %v147_v47, %v44_v46  ;;  %v270_v50 = vadd.f32 %v269_v48, %v44_v46 }
  0xd7   :  { %v149_v52 = vpop.f32.mrf.mxu0  ;;  %v271_v53 = vpop.f32.mrf.mxu1 }
  0xd8   :  { %170 = vst [vmem:[#allocation2] sm:$0xff] %v148_v49  ;;  %293 = vst [vmem:[#allocation2 + $0x40] sm:$0xff] %v270_v50  ;;  %v150_v54 = vadd.f32 %v149_v52, %v44_v46  ;;  %v272_v55 = vadd.f32 %v271_v53, %v44_v46 }
  0xd9   :  { %v153_v56 = vpop.f32.mrf.mxu0  ;;  %v275_v57 = vpop.f32.mrf.mxu1 }
  0xda   :  { %171 = vst [vmem:[#allocation2 + $0x8] sm:$0xff] %v150_v54  ;;  %294 = vst [vmem:[#allocation2 + $0x48] sm:$0xff] %v272_v55  ;;  %v154_v58 = vadd.f32 %v153_v56, %v49_v51  ;;  %v276_v59 = vadd.f32 %v275_v57, %v49_v51 }
  0xdb   :  { %v155_v61 = vpop.f32.mrf.mxu0  ;;  %v277_v62 = vpop.f32.mrf.mxu1 }
  0xdc   :  { %172 = vst [vmem:[#allocation2 + $0x10] sm:$0xff] %v154_v58  ;;  %295 = vst [vmem:[#allocation2 + $0x50] sm:$0xff] %v276_v59  ;;  %v156_v63 = vadd.f32 %v155_v61, %v49_v51  ;;  %v278_v0 = vadd.f32 %v277_v62, %v49_v51 }
  0xdd   :  { %v159_v1 = vpop.f32.mrf.mxu0  ;;  %v281_v2 = vpop.f32.mrf.mxu1 }
  0xde   :  { %173 = vst [vmem:[#allocation2 + $0x18] sm:$0xff] %v156_v63  ;;  %296 = vst [vmem:[#allocation2 + $0x58] sm:$0xff] %v278_v0  ;;  %v160_v3 = vadd.f32 %v159_v1, %v54_v60  ;;  %v282_v4 = vadd.f32 %v281_v2, %v54_v60 }
  0xdf   :  { %v161_v5 = vpop.f32.mrf.mxu0  ;;  %v283_v6 = vpop.f32.mrf.mxu1 }
  0xe0   :  { %174 = vst [vmem:[#allocation2 + $0x20] sm:$0xff] %v160_v3  ;;  %297 = vst [vmem:[#allocation2 + $0x60] sm:$0xff] %v282_v4  ;;  %v162_v8 = vadd.f32 %v161_v5, %v54_v60  ;;  %v284_v9 = vadd.f32 %v283_v6, %v54_v60 }
  0xe1   :  { %v165_v10 = vpop.f32.mrf.mxu0  ;;  %v287_v11 = vpop.f32.mrf.mxu1 }
  0xe2   :  { %175 = vst [vmem:[#allocation2 + $0x28] sm:$0xff] %v162_v8  ;;  %298 = vst [vmem:[#allocation2 + $0x68] sm:$0xff] %v284_v9  ;;  %v166_v12 = vadd.f32 %v165_v10, %v59_v7  ;;  %v288_v13 = vadd.f32 %v287_v11, %v59_v7 }
  0xe3   :  { %v167_v14 = vpop.f32.mrf.mxu0  ;;  %v289_v15 = vpop.f32.mrf.mxu1 }
  0xe4   :  { %176 = vst [vmem:[#allocation2 + $0x30] sm:$0xff] %v166_v12  ;;  %299 = vst [vmem:[#allocation2 + $0x70] sm:$0xff] %v288_v13  ;;  %v168_v16 = vadd.f32 %v167_v14, %v59_v7  ;;  %v290_v17 = vadd.f32 %v289_v15, %v59_v7 }
  0xe6   :  { %177 = vst [vmem:[#allocation2 + $0x38] sm:$0xff] %v168_v16  ;;  %300 = vst [vmem:[#allocation2 + $0x78] sm:$0xff] %v290_v17 }
  0xe7   :  { %365 = shalt.err (!%p362_p4)
}
  0xe8   :  { %s379_s19 = smov 256   ;;  %s380_s20 = smov 16  }
  0xe9   :  { %312 = dma.vmem_to_hbm [thread:$0]  %s307_s2, 2048, %s547_s3, [#allocation3], %s379_s19, %s379_s19, %s380_s20  }
  0xea   :  { %374 = dma.done.wait [#allocation3], 2048  }
  0xeb   :  { %375 = vsyncadd [#allocation3], 4294965248 }
  0xec   :  { %316 = vsyncpa [#allocation3], 1 }

</bundles_post_ra>
